<compile_context>
chip_gen: v7x
topology: tpu7x:2x2x1
jax: 0.10.0
libtpu: 0.0.40
codegen_flags: <defaults>
</compile_context>

<pallas_src>
import jax
import jax.numpy as jnp
from jax.experimental import pallas as pl
from jax.experimental.pallas import tpu as pltpu

LANE = 128          # vreg lane width: hidden dim padded to this
MAX_TILE_B = 1024   # batch tile (rows per grid step), multiple of 8


def _round_up(x, m):
    return ((x + m - 1) // m) * m


def critic_kernel(s_ref, a_ref, w1s_ref, w1a_ref, b1_ref,
                  w2_ref, b2_ref, w3_ref, b3_ref, o_ref):
    # layer 1: split matmul replaces concat([s, a]) @ W1
    h1 = jnp.dot(s_ref[...], w1s_ref[...], preferred_element_type=jnp.float32)
    h1 = h1 + jnp.dot(a_ref[...], w1a_ref[...],
                      preferred_element_type=jnp.float32)
    h1 = jnp.maximum(h1 + b1_ref[...], 0.0)
    # layer 2: Linear + ReLU (lane-dense 128-wide hidden)
    h2 = jnp.dot(h1, w2_ref[...], preferred_element_type=jnp.float32)
    h2 = jnp.maximum(h2 + b2_ref[...], 0.0)
    # layer 3: Linear (no activation); output block is the true (narrow) width
    q = jnp.dot(h2, w3_ref[...], preferred_element_type=jnp.float32) + b3_ref[...]
    o_ref[...] = q.astype(o_ref.dtype)


def init_critic_params(key, state_dim, action_dim, hidden_size, output_size):
    """Raw (unpadded) params mimicking nn.Linear default init.

    Weights are (in, out) = transpose of PyTorch's (out, in); biases (1, out).
    """
    input_size = state_dim + action_dim

    def linear(k, fan_in, fan_out):
        kw, kb = jax.random.split(k)
        bound = 1.0 / jnp.sqrt(fan_in)
        w = jax.random.uniform(kw, (fan_in, fan_out), jnp.float32, -bound, bound)
        b = jax.random.uniform(kb, (1, fan_out), jnp.float32, -bound, bound)
        return w, b

    k1, k2, k3 = jax.random.split(key, 3)
    w1, b1 = linear(k1, input_size, hidden_size)
    w2, b2 = linear(k2, hidden_size, hidden_size)
    w3, b3 = linear(k3, hidden_size, output_size)
    return (w1, b1, w2, b2, w3, b3)


def pack_critic_params(params, state_dim):
    """One-time packing for the kernel:
      * split W1 rows into the (s, a) halves,
      * zero-pad the hidden feature dim to the 128-lane width (padded lanes
        stay exactly 0 through ReLU and the following matmuls),
      * keep the final output dim at its true (narrow) width so the kernel
        writes the unpadded result directly.
    """
    w1, b1, w2, b2, w3, b3 = params
    hidden = w2.shape[0]
    out = w3.shape[1]
    h_pad = _round_up(hidden, LANE)

    def pad(x, rows, cols):
        return jnp.pad(x, ((0, rows - x.shape[0]), (0, cols - x.shape[1])))

    w1s = pad(w1[:state_dim], state_dim, h_pad)
    w1a = pad(w1[state_dim:], w1.shape[0] - state_dim, h_pad)
    b1p = pad(b1, 1, h_pad)
    w2p = pad(w2, h_pad, h_pad)
    b2p = pad(b2, 1, h_pad)
    w3p = pad(w3, h_pad, out)      # rows padded, columns stay narrow
    b3p = b3                       # (1, out), unpadded
    return (w1s, w1a, b1p, w2p, b2p, w3p, b3p)


def _pick_tile_b(batch):
    """Batch tile: full batch when tiny; otherwise a multiple-of-8 tile capped
    at MAX_TILE_B, chosen so the grid has >= 2 steps (lets the v7x second
    TensorCore share the 'parallel' batch axis; harmless on v5e/v6e)."""
    if batch <= 8:
        return batch
    half = -(-batch // 2)                 # ceil(batch / 2)
    return min(MAX_TILE_B, _round_up(half, 8))


@jax.jit
def critic_forward(s, a, packed_params):
    """s: (B, state_dim), a: (B, action_dim). Returns (B, output_size)."""
    w1s, w1a, b1, w2, b2, w3, b3 = packed_params
    batch = s.shape[0]
    state_dim = s.shape[1]
    action_dim = a.shape[1]
    output_size = w3.shape[1]

    tile_b = _pick_tile_b(batch)
    grid = (pl.cdiv(batch, tile_b),)

    batch_spec = lambda f: pl.BlockSpec((tile_b, f), lambda i: (i, 0))
    const_spec = lambda arr: pl.BlockSpec(arr.shape, lambda i: (0, 0))

    q = pl.pallas_call(
        critic_kernel,
        out_shape=jax.ShapeDtypeStruct((batch, output_size), jnp.float32),
        grid=grid,
        in_specs=[
            batch_spec(state_dim),          # s tile
            batch_spec(action_dim),         # a tile
            const_spec(w1s), const_spec(w1a), const_spec(b1),
            const_spec(w2), const_spec(b2),
            const_spec(w3), const_spec(b3),
        ],
        out_specs=batch_spec(output_size),  # narrow (unpadded) output tile
        compiler_params=pltpu.CompilerParams(
            dimension_semantics=("parallel",),
        ),
    )(s, a, w1s, w1a, b1, w2, b2, w3, b3)

    return q


def critic_reference(s, a, params):
    """Pure-JAX reference (unpadded params) for correctness checking."""
    w1, b1, w2, b2, w3, b3 = params
    x = jnp.concatenate([s, a], axis=1)
    x = jnp.maximum(x @ w1 + b1, 0.0)
    x = jnp.maximum(x @ w2 + b2, 0.0)
    return x @ w3 + b3


if __name__ == "__main__":
    # Small shapes consistent with the module's forward:
    batch = 2
    state_dim = 12
    action_dim = 4
    hidden_size = 32
    output_size = 1

    key = jax.random.PRNGKey(0)
    kp, ks, ka = jax.random.split(key, 3)

    params = init_critic_params(kp, state_dim, action_dim, hidden_size,
                                output_size)
    packed = pack_critic_params(params, state_dim)

    s = jax.random.normal(ks, (batch, state_dim), jnp.float32)
    a = jax.random.normal(ka, (batch, action_dim), jnp.float32)

    q = critic_forward(s, a, packed)
    q = jax.block_until_ready(q)

    q_ref = critic_reference(s, a, params)
    assert q.shape == (batch, output_size)
    assert jnp.allclose(q, q_ref, atol=1e-5, rtol=1e-5), "mismatch vs reference"

    # Also exercise a larger, multi-tile batch to cover the grid path
    # (and the >=2-step grid chosen for v7x sharding).
    big_b = 1000
    kbs, kba = jax.random.split(jax.random.PRNGKey(1))
    sb = jax.random.normal(kbs, (big_b, state_dim), jnp.float32)
    ab = jax.random.normal(kba, (big_b, action_dim), jnp.float32)
    qb = jax.block_until_ready(critic_forward(sb, ab, packed))
    qb_ref = critic_reference(sb, ab, params)
    assert qb.shape == (big_b, output_size)
    assert jnp.allclose(qb, qb_ref, atol=1e-4, rtol=1e-4), "mismatch (big batch)"

    print("KERNEL_OK")
</pallas_src>

<mosaic_0001>
module attributes {stable_mosaic.version = 11 : i64} {
  func.func @critic_kernel(%arg0: i32, %arg1: memref<2x12xf32, #tpu.memory_space<vmem>>, %arg2: memref<2x4xf32, #tpu.memory_space<vmem>>, %arg3: memref<12x128xf32, #tpu.memory_space<vmem>>, %arg4: memref<4x128xf32, #tpu.memory_space<vmem>>, %arg5: memref<1x128xf32, #tpu.memory_space<vmem>>, %arg6: memref<128x128xf32, #tpu.memory_space<vmem>>, %arg7: memref<1x128xf32, #tpu.memory_space<vmem>>, %arg8: memref<128x1xf32, #tpu.memory_space<vmem>>, %arg9: memref<1x1xf32, #tpu.memory_space<vmem>>, %arg10: memref<2x1xf32, #tpu.memory_space<vmem>>) attributes {dimension_semantics = [#tpu.dimension_semantics<parallel>], iteration_bounds = array<i64: 1>, scalar_prefetch = 0 : i64, scratch_operands = 0 : i64, tpu.core_type = #tpu.core_type<tc>, window_params = [{transform_indices = @transform_0, window_bounds = array<i64: 2, 12>}, {transform_indices = @transform_1, window_bounds = array<i64: 2, 4>}, {pipeline_mode = #tpu.pipeline_mode<synchronous>, transform_indices = @transform_2, window_bounds = array<i64: 12, 128>}, {pipeline_mode = #tpu.pipeline_mode<synchronous>, transform_indices = @transform_3, window_bounds = array<i64: 4, 128>}, {pipeline_mode = #tpu.pipeline_mode<synchronous>, transform_indices = @transform_4, window_bounds = array<i64: 1, 128>}, {pipeline_mode = #tpu.pipeline_mode<synchronous>, transform_indices = @transform_5, window_bounds = array<i64: 128, 128>}, {pipeline_mode = #tpu.pipeline_mode<synchronous>, transform_indices = @transform_6, window_bounds = array<i64: 1, 128>}, {pipeline_mode = #tpu.pipeline_mode<synchronous>, transform_indices = @transform_7, window_bounds = array<i64: 128, 1>}, {pipeline_mode = #tpu.pipeline_mode<synchronous>, transform_indices = @transform_8, window_bounds = array<i64: 1, 1>}, {transform_indices = @transform_9, window_bounds = array<i64: 2, 1>}]} {
    %c0 = arith.constant 0 : index
    %c0_0 = arith.constant 0 : index
    %0 = vector.load %arg1[%c0, %c0_0] : memref<2x12xf32, #tpu.memory_space<vmem>>, vector<2x12xf32>
    %c0_1 = arith.constant 0 : index
    %c0_2 = arith.constant 0 : index
    %1 = vector.load %arg3[%c0_1, %c0_2] : memref<12x128xf32, #tpu.memory_space<vmem>>, vector<12x128xf32>
    %cst = arith.constant dense<0.000000e+00> : vector<2x128xf32>
    %2 = tpu.matmul %0, %1, %cst {dimension_numbers = #tpu.dot_dimension_numbers<[1], [0], [0], [1], [0, 0, 1, 1], [], []>} : vector<2x12xf32>, vector<12x128xf32>, vector<2x128xf32> -> vector<2x128xf32>
    %c0_3 = arith.constant 0 : index
    %c0_4 = arith.constant 0 : index
    %3 = vector.load %arg2[%c0_3, %c0_4] : memref<2x4xf32, #tpu.memory_space<vmem>>, vector<2x4xf32>
    %c0_5 = arith.constant 0 : index
    %c0_6 = arith.constant 0 : index
    %4 = vector.load %arg4[%c0_5, %c0_6] : memref<4x128xf32, #tpu.memory_space<vmem>>, vector<4x128xf32>
    %cst_7 = arith.constant dense<0.000000e+00> : vector<2x128xf32>
    %5 = tpu.matmul %3, %4, %cst_7 {dimension_numbers = #tpu.dot_dimension_numbers<[1], [0], [0], [1], [0, 0, 1, 1], [], []>} : vector<2x4xf32>, vector<4x128xf32>, vector<2x128xf32> -> vector<2x128xf32>
    %6 = arith.addf %2, %5 : vector<2x128xf32>
    %c0_8 = arith.constant 0 : index
    %c0_9 = arith.constant 0 : index
    %7 = vector.load %arg5[%c0_8, %c0_9] : memref<1x128xf32, #tpu.memory_space<vmem>>, vector<1x128xf32>
    %8 = vector.broadcast %7 : vector<1x128xf32> to vector<2x128xf32>
    %9 = arith.addf %6, %8 : vector<2x128xf32>
    %cst_10 = arith.constant 0.000000e+00 : f32
    %10 = vector.broadcast %cst_10 : f32 to vector<2x128xf32>
    %11 = arith.maximumf %9, %10 : vector<2x128xf32>
    %c0_11 = arith.constant 0 : index
    %c0_12 = arith.constant 0 : index
    %12 = vector.load %arg6[%c0_11, %c0_12] : memref<128x128xf32, #tpu.memory_space<vmem>>, vector<128x128xf32>
    %cst_13 = arith.constant dense<0.000000e+00> : vector<2x128xf32>
    %13 = tpu.matmul %11, %12, %cst_13 {dimension_numbers = #tpu.dot_dimension_numbers<[1], [0], [0], [1], [0, 0, 1, 1], [], []>} : vector<2x128xf32>, vector<128x128xf32>, vector<2x128xf32> -> vector<2x128xf32>
    %c0_14 = arith.constant 0 : index
    %c0_15 = arith.constant 0 : index
    %14 = vector.load %arg7[%c0_14, %c0_15] : memref<1x128xf32, #tpu.memory_space<vmem>>, vector<1x128xf32>
    %15 = vector.broadcast %14 : vector<1x128xf32> to vector<2x128xf32>
    %16 = arith.addf %13, %15 : vector<2x128xf32>
    %cst_16 = arith.constant 0.000000e+00 : f32
    %17 = vector.broadcast %cst_16 : f32 to vector<2x128xf32>
    %18 = arith.maximumf %16, %17 : vector<2x128xf32>
    %c0_17 = arith.constant 0 : index
    %c0_18 = arith.constant 0 : index
    %19 = vector.load %arg8[%c0_17, %c0_18] : memref<128x1xf32, #tpu.memory_space<vmem>>, vector<128x1xf32>
    %cst_19 = arith.constant dense<0.000000e+00> : vector<2x1xf32>
    %20 = tpu.matmul %18, %19, %cst_19 {dimension_numbers = #tpu.dot_dimension_numbers<[1], [0], [0], [1], [0, 0, 1, 1], [], []>} : vector<2x128xf32>, vector<128x1xf32>, vector<2x1xf32> -> vector<2x1xf32>
    %c0_20 = arith.constant 0 : index
    %c0_21 = arith.constant 0 : index
    %21 = vector.load %arg9[%c0_20, %c0_21] : memref<1x1xf32, #tpu.memory_space<vmem>>, vector<1x1xf32>
    %22 = vector.broadcast %21 : vector<1x1xf32> to vector<2x1xf32>
    %23 = arith.addf %20, %22 : vector<2x1xf32>
    %c0_22 = arith.constant 0 : index
    %c0_23 = arith.constant 0 : index
    %24 = vector.load %arg10[%c0_22, %c0_23] : memref<2x1xf32, #tpu.memory_space<vmem>>, vector<2x1xf32>
    tpu.vector_store %arg10[%c0_22, %c0_23], %23 {strides = array<i32>} : memref<2x1xf32, #tpu.memory_space<vmem>>, vector<2x1xf32>,
    return
  }
  func.func @transform_0(%arg0: i32) -> (i32, i32) {
    %c0_i32 = arith.constant 0 : i32
    %c0_i32_0 = arith.constant 0 : i32
    return %arg0, %c0_i32 : i32, i32
  }
  func.func @transform_1(%arg0: i32) -> (i32, i32) {
    %c0_i32 = arith.constant 0 : i32
    %c0_i32_0 = arith.constant 0 : i32
    return %arg0, %c0_i32 : i32, i32
  }
  func.func @transform_2(%arg0: i32) -> (i32, i32) {
    %c0_i32 = arith.constant 0 : i32
    %c0_i32_0 = arith.constant 0 : i32
    %c0_i32_1 = arith.constant 0 : i32
    return %c0_i32, %c0_i32_0 : i32, i32
  }
  func.func @transform_3(%arg0: i32) -> (i32, i32) {
    %c0_i32 = arith.constant 0 : i32
    %c0_i32_0 = arith.constant 0 : i32
    %c0_i32_1 = arith.constant 0 : i32
    return %c0_i32, %c0_i32_0 : i32, i32
  }
  func.func @transform_4(%arg0: i32) -> (i32, i32) {
    %c0_i32 = arith.constant 0 : i32
    %c0_i32_0 = arith.constant 0 : i32
    %c0_i32_1 = arith.constant 0 : i32
    return %c0_i32, %c0_i32_0 : i32, i32
  }
  func.func @transform_5(%arg0: i32) -> (i32, i32) {
    %c0_i32 = arith.constant 0 : i32
    %c0_i32_0 = arith.constant 0 : i32
    %c0_i32_1 = arith.constant 0 : i32
    return %c0_i32, %c0_i32_0 : i32, i32
  }
  func.func @transform_6(%arg0: i32) -> (i32, i32) {
    %c0_i32 = arith.constant 0 : i32
    %c0_i32_0 = arith.constant 0 : i32
    %c0_i32_1 = arith.constant 0 : i32
    return %c0_i32, %c0_i32_0 : i32, i32
  }
  func.func @transform_7(%arg0: i32) -> (i32, i32) {
    %c0_i32 = arith.constant 0 : i32
    %c0_i32_0 = arith.constant 0 : i32
    %c0_i32_1 = arith.constant 0 : i32
    return %c0_i32, %c0_i32_0 : i32, i32
  }
  func.func @transform_8(%arg0: i32) -> (i32, i32) {
    %c0_i32 = arith.constant 0 : i32
    %c0_i32_0 = arith.constant 0 : i32
    %c0_i32_1 = arith.constant 0 : i32
    return %c0_i32, %c0_i32_0 : i32, i32
  }
  func.func @transform_9(%arg0: i32) -> (i32, i32) {
    %c0_i32 = arith.constant 0 : i32
    %c0_i32_0 = arith.constant 0 : i32
    return %arg0, %c0_i32 : i32, i32
  }
}

</mosaic_0001>

<bundles_post_ra>
// kernel: critic_forward.1
= control target key start
LH: loop header
LB: loop body
LE: loop exit
PB: predicated region body
PF: predicated region fallthrough
CT: control target
= control target key end

     0   :  { %s826_s0 = inlined_call_operand.vmem [shape: f32[2,12], index: 0, kind: input, shape index: {}]   ;;  %s827_s1 = inlined_call_operand.hbm [shape: f32[2,4], index: 1, kind: input, shape index: {}]   ;;  %s828_s2 = inlined_call_operand.vmem [shape: f32[12,128], index: 2, kind: input, shape index: {}]   ;;  %s829_s3 = inlined_call_operand.vmem [shape: f32[4,128], index: 3, kind: input, shape index: {}]   ;;  %s830_s4 = inlined_call_operand.vmem [shape: f32[1,128], index: 4, kind: input, shape index: {}]   ;;  %s831_s5 = inlined_call_operand.vmem [shape: f32[128,128], index: 5, kind: input, shape index: {}]   ;;  %s832_s6 = inlined_call_operand.vmem [shape: f32[1,128], index: 6, kind: input, shape index: {}]   ;;  %s833_s7 = inlined_call_operand.vmem [shape: f32[128,1], index: 7, kind: input, shape index: {}]   ;;  %s834_s8 = inlined_call_operand.<no memory space> [shape: f32[1,1], index: 8, kind: input, shape index: {}]   ;;  %s835_s9 = inlined_call_operand.vmem [shape: f32[2,1], index: 9, kind: output, shape index: {}]  }
   0x1   :  { %v14_v0 = vstv %s834_s8 }
   0x2   :  { %15 = vst [vmem:[#allocation2] sm:$0x1] %v14_v0 }
   0x3   :  { %16 = vsyncpa [#allocation4], 0  ;;  %s618_s11 = smov [#allocation3]   ;;  %s594_s15 = scalar_lea.hbm %s827_s1, 32 }
   0x4   :  { %s25_s12 = sshll.u32 %s618_s11, 4  ;;  %p595_p0 = scmp.ne.s32.totalorder %s827_s1, %s594_s15  ;;  %s26_s12 = int_to_ptr.vmem [resolvable:$true] %s25_s12 }
   0x5   :  { %p598_p1 = scmp.lt.u32.totalorder %s594_s15, %s827_s1 }
   0x7   :  { %p600_p2 = pnand %p598_p1, %p595_p0 }
   0x9   :  { %603 = shalt.err (!%p600_p2)
}
   0xa   :  { %s604_s8 = scalar_lea.vmem %s26_s12, 32  ;;  %p609_p4 = scmp.lt.s32.totalorder %s26_s12, %s26_s12 }
   0xb   :  { %p605_p3 = scmp.ne.s32.totalorder %s26_s12, %s604_s8  ;;  %p610_p5 = scmp.lt.s32.totalorder %s604_s8, %s604_s8 }
   0xd   :  { %p611_p6 = por %p610_p5, %p609_p4 }
   0xf   :  { %p612_p7 = pnand %p611_p6, %p605_p3 }
  0x11   :  { %615 = shalt.err (!%p612_p7)
}
  0x12   :  { %28 = dma.hbm_to_vmem [thread:$0]  %s827_s1, 32, %s26_s12, [#allocation4]  }
  0x13   :  { %616 = dma.done.wait [#allocation4], 32  }
  0x14   :  { %617 = vsyncadd [#allocation4], 4294967264  ;;  %v619_v1 = vmov 0.0|0.0   ;;  %v620_v2 = vmov 0.0   ;;  %vm621_vm0 = vmmov 0   ;;  %vm55_vm1 = vcmask 1043456  }
  0x15   :  { %537 = vmatprep.subr.bf16.mxu1 %v619_v1  ;;  %455 = vmatprep.subr.mxu0 %v620_v2  ;;  %vm622_vm2 = vmmov 1   ;;  %vm51_vm4 = vcmask 31744   ;;  %v47_v3 = vld [vmem:[%s828_s2] sm:$0xff]  ;;  %v48_v4 = vld [vmem:[%s828_s2 + $0x8] sm:$0xf]  ;;  %v217_v10 = vld [vmem:[%s831_s5 + $0x10] sm:$0xff] }
  0x16   :  { %457 = vmatprep.mubr.msk.f32.mxu0 %vm621_vm0, %v620_v2  ;;  %464 = vmatprep.mubr.msk.f32.mxu1 %vm621_vm0, %v620_v2  ;;  %vm539_vm3 = vmpackc.low %vm55_vm1, %vm622_vm2  ;;  %v50_v5 = vld [vmem:[%s829_s3] sm:$0xf]  ;;  %v538_v6 = vpack.c.bf16 %v48_v4, %v47_v3  ;;  %v216_v9 = vld [vmem:[%s831_s5 + $0x8] sm:$0xff]  ;;  %vm129_vm5 = vcmask 97280   ;;  %vm402_vm6 = vcmask 1024  }
  0x17   :  { %456 = vmatpush3.msk.msra.mxu0 %vm55_vm1, %v50_v5  ;;  %v49_v7 = vld [vmem:[#allocation3] sm:$0x3]  ;;  %v218_v11 = vld [vmem:[%s831_s5 + $0x18] sm:$0xff]  ;;  %v220_v16 = vld [vmem:[%s831_s5 + $0x28] sm:$0xff] }
  0x18   :  { %v215_v8 = vld [vmem:[%s831_s5] sm:$0xff]  ;;  %458 = vmatmul.mubr.msk.f32.vlgmr.msra.gmra.mrb[0].mxu0 %vm51_vm4, %v49_v7  ;;  %541 = vmatprep.subr.bf16.mxu0 %v619_v1  ;;  %v545_v14 = vpack.c.bf16 %v218_v11, %v217_v10  ;;  %v221_v18 = vld [vmem:[%s831_s5 + $0x30] sm:$0xff]  ;;  %v222_v19 = vld [vmem:[%s831_s5 + $0x38] sm:$0xff] }
  0x19   :  { %540 = vmatpush3.bf16.msk.msra.mxu1 %vm539_vm3, %v538_v6  ;;  %v46_v12 = vld [vmem:[%s826_s0] sm:$0x3]  ;;  %v542_v13 = vpack.c.bf16 %v216_v9, %v215_v8  ;;  %499 = vmatprep.mubr.msk.f32.mxu0 %vm621_vm0, %v620_v2  ;;  %v551_v20 = vpack.c.bf16 %v222_v19, %v221_v18  ;;  %v224_v22 = vld [vmem:[%s831_s5 + $0x48] sm:$0xff]  ;;  %v225_v24 = vld [vmem:[%s831_s5 + $0x50] sm:$0xff] }
  0x1a   :  { %565 = vmatprep.subr.bf16.mxu1 %v619_v1  ;;  %v219_v15 = vld [vmem:[%s831_s5 + $0x20] sm:$0xff]  ;;  %v226_v25 = vld [vmem:[%s831_s5 + $0x58] sm:$0xff]  ;;  %v228_v28 = vld [vmem:[%s831_s5 + $0x68] sm:$0xff] }
  0x1b   :  { %543 = vmatpush3.bf16.msra.mxu0 %v542_v13  ;;  %v548_v17 = vpack.c.bf16 %v220_v16, %v219_v15  ;;  %v223_v21 = vld [vmem:[%s831_s5 + $0x40] sm:$0xff]  ;;  %v557_v26 = vpack.c.bf16 %v226_v25, %v225_v24  ;;  %v229_v30 = vld [vmem:[%s831_s5 + $0x70] sm:$0xff]  ;;  %v230_v31 = vld [vmem:[%s831_s5 + $0x78] sm:$0xff] }
  0x1c   :  { %465 = vmatmul.mubr.msk.f32.vlgmr.msra.gmra.mrb[0].mxu1 %vm129_vm5, %v46_v12  ;;  %544 = vmatprep.subr.bf16.mxu0 %v619_v1  ;;  %v554_v23 = vpack.c.bf16 %v224_v22, %v223_v21  ;;  %v227_v27 = vld [vmem:[%s831_s5 + $0x60] sm:$0xff]  ;;  %v563_v32 = vpack.c.bf16 %v230_v31, %v229_v30  ;;  %v310_v34 = vld [vmem:[%s833_s7 + $0x8] sm:$0xff]  ;;  %v311_v35 = vld [vmem:[%s833_s7 + $0x10] sm:$0xff] }
  0x1d   :  { %534 = vmatprep.mubr.msk.f32.mxu1 %vm621_vm0, %v620_v2  ;;  %v560_v29 = vpack.c.bf16 %v228_v28, %v227_v27  ;;  %v309_v33 = vld [vmem:[%s833_s7] sm:$0xff]  ;;  %v312_v37 = vld [vmem:[%s833_s7 + $0x18] sm:$0xff]  ;;  %v314_v40 = vld [vmem:[%s833_s7 + $0x28] sm:$0xff] }
  0x1e   :  { %v566_v36 = vpack.c.bf16 %v310_v34, %v309_v33  ;;  %v569_v38 = vpack.c.bf16 %v312_v37, %v311_v35  ;;  %v313_v39 = vld [vmem:[%s833_s7 + $0x20] sm:$0xff]  ;;  %v315_v42 = vld [vmem:[%s833_s7 + $0x30] sm:$0xff]  ;;  %v316_v43 = vld [vmem:[%s833_s7 + $0x38] sm:$0xff] }
  0x1f   :  { %546 = vmatpush3.bf16.msra.mxu0 %v545_v14  ;;  %v572_v41 = vpack.c.bf16 %v314_v40, %v313_v39  ;;  %v575_v44 = vpack.c.bf16 %v316_v43, %v315_v42  ;;  %v317_v45 = vld [vmem:[%s833_s7 + $0x40] sm:$0xff]  ;;  %v318_v46 = vld [vmem:[%s833_s7 + $0x48] sm:$0xff]  ;;  %v319_v48 = vld [vmem:[%s833_s7 + $0x50] sm:$0xff] }
  0x20   :  { %547 = vmatprep.subr.bf16.mxu0 %v619_v1  ;;  %567 = vmatpush3.bf16.msra.mxu1 %v566_v36  ;;  %v578_v47 = vpack.c.bf16 %v318_v46, %v317_v45  ;;  %v320_v49 = vld [vmem:[%s833_s7 + $0x58] sm:$0xff]  ;;  %v321_v51 = vld [vmem:[%s833_s7 + $0x60] sm:$0xff]  ;;  %v322_v52 = vld [vmem:[%s833_s7 + $0x68] sm:$0xff] }
  0x21   :  { %568 = vmatprep.subr.bf16.mxu1 %v619_v1  ;;  %v581_v50 = vpack.c.bf16 %v320_v49, %v319_v48  ;;  %v584_v53 = vpack.c.bf16 %v322_v52, %v321_v51  ;;  %v413_v57 = vld [vmem:[%s830_s4] ss:$0 sm:$0xff]  ;;  %v323_v62 = vld [vmem:[%s833_s7 + $0x70] sm:$0xff]  ;;  %v324_v63 = vld [vmem:[%s833_s7 + $0x78] sm:$0xff] }
  0x22   :  { %v587_v0 = vpack.c.bf16 %v324_v63, %v323_v62  ;;  %v415_v6 = vld [vmem:[#allocation2] ss:$0 sm:$0xff] }
  0x23   :  { %549 = vmatpush3.bf16.msra.mxu0 %v548_v17 }
  0x24   :  { %550 = vmatprep.subr.bf16.mxu0 %v619_v1  ;;  %570 = vmatpush3.bf16.msra.mxu1 %v569_v38 }
  0x25   :  { %571 = vmatprep.subr.bf16.mxu1 %v619_v1 }
  0x27   :  { %552 = vmatpush3.bf16.msra.mxu0 %v551_v20 }
  0x28   :  { %553 = vmatprep.subr.bf16.mxu0 %v619_v1  ;;  %573 = vmatpush3.bf16.msra.mxu1 %v572_v41 }
  0x29   :  { %574 = vmatprep.subr.bf16.mxu1 %v619_v1 }
  0x2b   :  { %555 = vmatpush3.bf16.msra.mxu0 %v554_v23 }
  0x2c   :  { %556 = vmatprep.subr.bf16.mxu0 %v619_v1  ;;  %576 = vmatpush3.bf16.msra.mxu1 %v575_v44 }
  0x2d   :  { %577 = vmatprep.subr.bf16.mxu1 %v619_v1 }
  0x2f   :  { %558 = vmatpush3.bf16.msra.mxu0 %v557_v26 }
  0x30   :  { %559 = vmatprep.subr.bf16.mxu0 %v619_v1  ;;  %579 = vmatpush3.bf16.msra.mxu1 %v578_v47 }
  0x31   :  { %580 = vmatprep.subr.bf16.mxu1 %v619_v1 }
  0x33   :  { %561 = vmatpush3.bf16.msra.mxu0 %v560_v29 }
  0x34   :  { %562 = vmatprep.subr.bf16.mxu0 %v619_v1  ;;  %582 = vmatpush3.bf16.msra.mxu1 %v581_v50 }
  0x35   :  { %583 = vmatprep.subr.bf16.mxu1 %v619_v1 }
  0x37   :  { %564 = vmatpush3.bf16.msra.mxu0 %v563_v32 }
  0x38   :  { %585 = vmatpush3.bf16.msra.mxu1 %v584_v53 }
  0x39   :  { %586 = vmatprep.subr.bf16.mxu1 %v619_v1  ;;  %v414_v1 = vld [vmem:[%s832_s6] ss:$0 sm:$0xff] }
  0x3c   :  { %588 = vmatpush3.bf16.msra.mxu1 %v587_v0 }
  0xeb   :  { %v125_v54 = vpop.f32.mrb[0].mxu0 }
  0xec   :  { %v459_v55 = vpop.f32.mrb[1].mxu0 }
  0xef   :  { %v202_v56 = vpop.f32.mrb[0].mxu1 }
  0xf0   :  { %v203_v58 = vadd.f32 %v202_v56, %v125_v54  ;;  %v466_v59 = vpop.f32.mrb[1].mxu1 }
  0xf2   :  { %v213_v60 = vadd.f32 %v413_v57, %v203_v58 }
  0xf4   :  { %v214_v61 = vmax.f32 %v213_v60, 0.0 }
  0xf6   :  { %500 = vmatmul.mubr.f32.vlgmr.msra.gmra.mrb[2].mxu0 %v214_v61 }
 0x1c9   :  { %v304_v2 = vpop.f32.mrb[2].mxu0 }
 0x1ca   :  { %v305_v3 = vadd.f32 %v414_v1, %v304_v2  ;;  %v501_v4 = vpop.f32.mrb[3].mxu0 }
 0x1cc   :  { %v308_v5 = vmax.f32 %v305_v3, 0.0 }
 0x1ce   :  { %535 = vmatmul.mubr.f32.vlgmr.msra.gmra.mrb[2].mxu1 %v308_v5 }
 0x2a1   :  { %v398_v7 = vpop.f32.mrb[2].mxu1 }
 0x2a2   :  { %v399_v8 = vadd.f32 %v415_v6, %v398_v7  ;;  %v536_v9 = vpop.f32.mrb[3].mxu1 }
 0x2a4   :  { %403 = vst.msk [vmem:[%s835_s9] sm:$0x3] %vm402_vm6, %v399_v8 }
 0x2a5   :  { %408 = vsyncpa [#allocation4], 1 }

</bundles_post_ra>
